<compile_context>
chip_gen: v7x
topology: tpu7x:2x2x1
jax: 0.10.0
libtpu: 0.0.40
codegen_flags: <defaults>
</compile_context>

<pallas_src>
import functools

import jax
import jax.numpy as jnp
from jax.experimental import pallas as pl
from jax.experimental.pallas import tpu as pltpu


def _h_sigmoid_kernel(x_ref, o_ref):
    # Compute in f32 then cast back: the kernel is HBM-bound (~4 VALU ops/elem),
    # so the up/down cast is free and avoids bf16 rounding of the 1/6 constant.
    xf = x_ref[...].astype(jnp.float32)
    y = jnp.clip(xf + 3.0, 0.0, 6.0) * (1.0 / 6.0)
    o_ref[...] = y.astype(o_ref.dtype)


def h_sigmoid_ref(x):
    """Pure-JAX reference (also used as the fused-XLA fallback path)."""
    xf = x.astype(jnp.float32)
    return (jnp.clip(xf + 3.0, 0.0, 6.0) / 6.0).astype(x.dtype)


_TARGET_TILE_BYTES = 4 << 20   # ~4 MiB per tile, per array, per buffer
_VMEM_LIMIT_BYTES = 48 << 20   # in (3x) + out (2x) 4 MiB tiles ~= 20 MiB in flight,
                               # with headroom; < v7x 64 MiB physical, > v5e 16 MiB default


@functools.partial(jax.jit, static_argnames=("min_pallas_bytes",))
def h_sigmoid(x, *, min_pallas_bytes=1 << 20):
    """Elementwise hard sigmoid: ReLU6(x + 3) / 6 (same semantics as the PyTorch module)."""
    orig_shape, orig_dtype = x.shape, x.dtype
    n = x.size
    if n == 0:
        return x

    itemsize = orig_dtype.itemsize
    nbytes = n * itemsize

    # Tiny tensors: a standalone kernel can't beat XLA fusing this elementwise op
    # into its producer (e.g. the preceding conv in mobilenet_v2ca).
    if nbytes < min_pallas_bytes:
        return h_sigmoid_ref(x)

    # Wide, lane-dense last dim that divides n exactly so the reshape is pure
    # metadata (no pad/slice/concat HBM passes).  Conv activations are
    # essentially always multiples of 1024.
    lanes = None
    for cand in (1024, 512, 256, 128):
        if n % cand == 0:
            lanes = cand
            break
    if lanes is None:
        # Ragged size (not even a multiple of 128): any pad+slice or
        # prefix+tail+concat adds full extra HBM passes, which is worse than one
        # fused XLA elementwise pass — so just do that.
        return h_sigmoid_ref(x)

    rows = n // lanes
    x2d = x.reshape(rows, lanes)

    # Packed-sublane granularity: 8 (f32), 16 (bf16/f16), 32 (int8/fp8).
    pack = max(8, 32 // itemsize)

    if rows <= 2 * pack:
        # Small: single full-extent block (full-dim rows is always a legal block).
        block_rows = rows
    else:
        # Biggest block that (a) stays ~4 MiB regardless of dtype and (b) leaves
        # >= 4 grid steps (>= 2 per v7x TensorCore) so both cores keep
        # DMA/compute overlap on medium tensors.
        target_rows = max(pack, (_TARGET_TILE_BYTES // (lanes * itemsize)) // pack * pack)
        quarter_rows = ((pl.cdiv(rows, 4) + pack - 1) // pack) * pack
        block_rows = min(target_rows, quarter_rows)

    grid_steps = pl.cdiv(rows, block_rows)   # ragged last block masked by Pallas

    if grid_steps >= 4:
        # Deeper input prefetch hides DMA issue jitter on a pure streaming kernel.
        in_spec = pl.BlockSpec((block_rows, lanes), lambda i: (i, 0),
                               pipeline_mode=pl.Buffered(3))
    else:
        in_spec = pl.BlockSpec((block_rows, lanes), lambda i: (i, 0))

    out2d = pl.pallas_call(
        _h_sigmoid_kernel,
        out_shape=jax.ShapeDtypeStruct((rows, lanes), orig_dtype),
        grid_spec=pltpu.PrefetchScalarGridSpec(
            num_scalar_prefetch=0,
            grid=(grid_steps,),
            in_specs=[in_spec],
            out_specs=pl.BlockSpec((block_rows, lanes), lambda i: (i, 0)),
        ),
        compiler_params=pltpu.CompilerParams(
            dimension_semantics=("parallel",),
            vmem_limit_bytes=_VMEM_LIMIT_BYTES),
    )(x2d)

    return out2d.reshape(orig_shape)


if __name__ == "__main__":
    key = jax.random.PRNGKey(0)

    # Small NCHW input consistent with how h_sigmoid is used inside mobilenet_v2ca.
    x = jax.random.normal(key, (2, 4, 16, 16), dtype=jnp.float32) * 4.0
    y = h_sigmoid(x, min_pallas_bytes=0)      # force the Pallas path for the tiny case
    jax.block_until_ready(y)
    assert y.shape == x.shape and y.dtype == x.dtype
    assert jnp.allclose(y, h_sigmoid_ref(x), atol=1e-6, rtol=1e-6)

    # Larger, realistic activation: multi-step grid (>=4 steps), ragged last block,
    # Buffered(3) input pipeline.
    x_big = jax.random.normal(jax.random.PRNGKey(1), (2, 96, 56, 56), dtype=jnp.float32) * 4.0
    y_big = h_sigmoid(x_big)
    jax.block_until_ready(y_big)
    assert y_big.shape == x_big.shape and y_big.dtype == x_big.dtype
    assert jnp.allclose(y_big, h_sigmoid_ref(x_big), atol=1e-6, rtol=1e-6)

    # bf16 activation exercises the dtype-aware (16-row packed) block sizing.
    x_bf16 = (jax.random.normal(jax.random.PRNGKey(2), (2, 96, 28, 28)) * 4.0).astype(jnp.bfloat16)
    y_bf16 = h_sigmoid(x_bf16, min_pallas_bytes=0)
    jax.block_until_ready(y_bf16)
    assert y_bf16.shape == x_bf16.shape and y_bf16.dtype == jnp.bfloat16
    assert jnp.allclose(y_bf16.astype(jnp.float32),
                        h_sigmoid_ref(x_bf16).astype(jnp.float32),
                        atol=1e-2, rtol=1e-2)

    # Ragged element count (not a multiple of 128) takes the fused-XLA fallback
    # (no pad/slice round-trip anywhere).
    x_odd = jax.random.normal(jax.random.PRNGKey(3), (3, 5, 7), dtype=jnp.float32) * 4.0
    y_odd = h_sigmoid(x_odd, min_pallas_bytes=0)
    jax.block_until_ready(y_odd)
    assert y_odd.shape == x_odd.shape and y_odd.dtype == x_odd.dtype
    assert jnp.allclose(y_odd, h_sigmoid_ref(x_odd), atol=1e-6, rtol=1e-6)

    print("KERNEL_OK")
</pallas_src>

<mosaic_0001>
module attributes {stable_mosaic.version = 11 : i64} {
  func.func @_h_sigmoid_kernel(%arg0: i32, %arg1: memref<2x1024xf32, #tpu.memory_space<vmem>>, %arg2: memref<2x1024xf32, #tpu.memory_space<vmem>>) attributes {dimension_semantics = [#tpu.dimension_semantics<parallel>], iteration_bounds = array<i64: 1>, scalar_prefetch = 0 : i64, scratch_operands = 0 : i64, tpu.core_type = #tpu.core_type<tc>, window_params = [{transform_indices = @transform_0, window_bounds = array<i64: 2, 1024>}, {transform_indices = @transform_1, window_bounds = array<i64: 2, 1024>}]} {
    %c0 = arith.constant 0 : index
    %c0_0 = arith.constant 0 : index
    %0 = vector.load %arg1[%c0, %c0_0] : memref<2x1024xf32, #tpu.memory_space<vmem>>, vector<2x1024xf32>
    %cst = arith.constant 3.000000e+00 : f32
    %1 = vector.broadcast %cst : f32 to vector<2x1024xf32>
    %2 = arith.addf %0, %1 : vector<2x1024xf32>
    %cst_1 = arith.constant 0.000000e+00 : f32
    %cst_2 = arith.constant 6.000000e+00 : f32
    %3 = vector.broadcast %cst_1 : f32 to vector<2x1024xf32>
    %4 = arith.maximumf %3, %2 : vector<2x1024xf32>
    %5 = vector.broadcast %cst_2 : f32 to vector<2x1024xf32>
    %6 = arith.minimumf %5, %4 : vector<2x1024xf32>
    %cst_3 = arith.constant 0.166666672 : f32
    %7 = vector.broadcast %cst_3 : f32 to vector<2x1024xf32>
    %8 = arith.mulf %6, %7 : vector<2x1024xf32>
    %c0_4 = arith.constant 0 : index
    %c0_5 = arith.constant 0 : index
    %9 = vector.load %arg2[%c0_4, %c0_5] : memref<2x1024xf32, #tpu.memory_space<vmem>>, vector<2x1024xf32>
    tpu.vector_store %arg2[%c0_4, %c0_5], %8 {strides = array<i32>} : memref<2x1024xf32, #tpu.memory_space<vmem>>, vector<2x1024xf32>,
    return
  }
  func.func @transform_0(%arg0: i32) -> (i32, i32) {
    %c0_i32 = arith.constant 0 : i32
    %c0_i32_0 = arith.constant 0 : i32
    return %arg0, %c0_i32 : i32, i32
  }
  func.func @transform_1(%arg0: i32) -> (i32, i32) {
    %c0_i32 = arith.constant 0 : i32
    %c0_i32_0 = arith.constant 0 : i32
    return %arg0, %c0_i32 : i32, i32
  }
}

</mosaic_0001>

<bundles_post_ra>
// kernel: h_sigmoid.1
= control target key start
LH: loop header
LB: loop body
LE: loop exit
PB: predicated region body
PF: predicated region fallthrough
CT: control target
= control target key end

     0   :  { %s46_s0 = inlined_call_operand.vmem [shape: f32[2,1024], index: 0, kind: input, shape index: {}]   ;;  %s47_s1 = inlined_call_operand.vmem [shape: f32[2,1024], index: 1, kind: output, shape index: {}]  }
   0x1   :  { %v8_v0 = vld [vmem:[%s46_s0] sm:$0xff]  ;;  %v9_v1 = vld [vmem:[%s46_s0 + $0x8] sm:$0xff] }
   0x2   :  { %v10_v2 = vadd.f32 3.0, %v8_v0  ;;  %v11_v3 = vadd.f32 3.0, %v9_v1 }
   0x4   :  { %v12_v4 = vmax.f32 %v10_v2, 0.0  ;;  %v13_v5 = vmax.f32 %v11_v3, 0.0 }
   0x6   :  { %v14_v6 = vmin.f32 %v12_v4, 6.0  ;;  %v15_v7 = vmin.f32 %v13_v5, 6.0 }
   0x8   :  { %v16_v8 = vmul.f32 0.16666667, %v14_v6  ;;  %v17_v9 = vmul.f32 0.16666667, %v15_v7 }
   0xa   :  { %18 = vst [vmem:[%s47_s1] sm:$0xff] %v16_v8  ;;  %19 = vst [vmem:[%s47_s1 + $0x8] sm:$0xff] %v17_v9 }

</bundles_post_ra>
